<compile_context>
chip_gen: v5e
topology: v5e:2x2
jax: 0.10.0
libtpu: 0.0.40
codegen_flags: <defaults>
</compile_context>

<pallas_src>
import functools
import math

import jax
import jax.numpy as jnp
from jax.experimental import pallas as pl
from jax.experimental.pallas import tpu as pltpu

_IGNORE_INDEX = -100
_EPS = 1e-8

_SINGLE_BLOCK_MAX_C = 4096        # above this, tile the class axis ("arbitrary" grid axis)
_MAX_CLASS_TILE = 2048
_MIN_STEP_BYTES = 4 * 1024 * 1024  # per-grid-step logits byte floor (amortize ~0.35us/step)
_ROW_TILE_BASE_CAP = 1024
_NEG_BIG = -1e30                   # finite "minus infinity" so exp underflows without NaN


def _round_up(x, m):
    return ((x + m - 1) // m) * m


def _vmem_sizing():
    """Generation-aware (tile_budget_bytes, vmem_limit_bytes)."""
    try:
        cap = int(pltpu.get_tpu_info().vmem_capacity_bytes)
    except Exception:  # unknown backend / interpret mode -> conservative (v7x-safe)
        cap = 64 * 1024 * 1024
    if cap >= 100 * 1024 * 1024:                     # v5e / v6e: 128 MiB per TensorCore
        return 32 * 1024 * 1024, 96 * 1024 * 1024
    return 16 * 1024 * 1024, 48 * 1024 * 1024        # v7x-class: 64 MiB per TensorCore


def _choose_tm(n_rows, c_block, itemsize, tile_budget):
    """Row tile: as large as the VMEM budget allows, with a per-step byte floor."""
    sub = max(8, 32 // itemsize)                     # 8 rows (f32) / 16 rows (bf16)
    per_row = c_block * (2 * itemsize + 12)          # 2x-buffered logits + ~3 f32 temps
    tm = max(sub, tile_budget // per_row)
    # Per-step byte floor instead of a hard 1024 cap: for small C keep growing TM
    # until each grid step moves >= _MIN_STEP_BYTES of logits.
    floor_rows = -(-_MIN_STEP_BYTES // max(1, c_block * itemsize))
    tm = min(tm, max(_ROW_TILE_BASE_CAP, floor_rows))
    # Never bigger than the row count.
    tm = min(tm, _round_up(n_rows, sub))
    # Keep >= 2 row-grid steps when possible so both v7x TensorCores get work
    # (harmless extra grid step on single-TC v5e/v6e).
    if n_rows > sub:
        tm = min(tm, _round_up(-(-n_rows // 2), sub))
    return max(sub, (tm // sub) * sub)


def _find_class_tile(c):
    """Class tile: prefer a 128-multiple divisor of C; else ragged tail (masked in-kernel)."""
    for tc in range(_MAX_CLASS_TILE, 127, -128):
        if c % tc == 0:
            return tc
    return min(_MAX_CLASS_TILE, (c // 128) * 128)


def _mile_single_c_kernel(logits_ref, tgt_ref, ce_ref, pt_ref):
    """Per-row CE + softmax entropy when the whole class dim fits one (TM, C) block."""
    x = logits_ref[...].astype(jnp.float32)                 # (TM, C)
    t = tgt_ref[...]                                        # (TM, 1) int32

    m = jnp.max(x, axis=-1, keepdims=True)                  # (TM, 1)
    z = x - m                                               # x dead after this line

    # CE target gather on z (ignore_index / out-of-range targets never match).
    cls = jax.lax.broadcasted_iota(jnp.int32, z.shape, 1)
    z_t = jnp.sum(jnp.where(cls == t, z, 0.0), axis=-1, keepdims=True)

    ez = jnp.exp(z)                                         # EUP; only per-element transcendental
    se = jnp.sum(ez, axis=-1, keepdims=True)
    s = jnp.sum(ez * z, axis=-1, keepdims=True)
    log_se = jnp.log(se)

    # ce = lse - x_t = log(se) - z_t
    ce_ref[...] = jnp.where(t != _IGNORE_INDEX, log_se - z_t, 0.0)
    # Entropy via the identity H = log(se) - sum(ez*z)/se.
    # NOTE: drops torch.clamp(probs, 1e-8, 1) parity; it only differs when a softmax
    # prob underflows 1e-8 (delta <= ~1.8e-7 nats per such class).
    # Per-row exact divide kept (O(TM) work; approx vrcp would cost ~1e-3 rel error).
    pt_ref[...] = log_se - s / se


def _mile_tiled_c_kernel(logits_ref, tgt_ref, ce_ref, pt_ref,
                         m_sc, l_sc, s_sc, tg_sc, *, class_tile, num_classes):
    """Online-softmax variant: class axis is grid axis 1 ('arbitrary')."""
    j = pl.program_id(1)

    @pl.when(j == 0)
    def _():
        m_sc[...] = jnp.full_like(m_sc[...], -jnp.inf)
        l_sc[...] = jnp.zeros_like(l_sc[...])
        s_sc[...] = jnp.zeros_like(s_sc[...])
        tg_sc[...] = jnp.zeros_like(tg_sc[...])

    x = logits_ref[...].astype(jnp.float32)                 # (TM, TC)
    t = tgt_ref[...]                                        # (TM, 1)
    cls = jax.lax.broadcasted_iota(jnp.int32, x.shape, 1)

    # Target gather: shift the (TM,1) target instead of the (TM,TC) iota
    # (ignore_index still never matches; garbage tail columns never match either).
    match = cls == (t - j * class_tile)
    tg_sc[...] = tg_sc[...] + jnp.sum(jnp.where(match, x, 0.0), axis=-1, keepdims=True)

    if num_classes % class_tile != 0:
        # Ragged last class tile: columns >= num_classes hold garbage; mask them to a
        # large negative finite value so exp underflows to 0 without producing NaNs.
        x = jnp.where(cls < (num_classes - j * class_tile), x, _NEG_BIG)

    m_prev = m_sc[...]
    m_new = jnp.maximum(m_prev, jnp.max(x, axis=-1, keepdims=True))
    corr = jnp.exp(m_prev - m_new)                          # rescale previous partials
    ez = jnp.exp(x - m_new)
    l_sc[...] = corr * l_sc[...] + jnp.sum(ez, axis=-1, keepdims=True)
    s_sc[...] = corr * s_sc[...] + jnp.sum(ez * x, axis=-1, keepdims=True)
    m_sc[...] = m_new

    @pl.when(j == pl.num_programs(1) - 1)
    def _():
        lse = m_sc[...] + jnp.log(l_sc[...])
        ce_ref[...] = jnp.where(t != _IGNORE_INDEX, lse - tg_sc[...], 0.0)
        # H = lse - E[x]; same clamp-parity note as the single-block kernel.
        pt_ref[...] = lse - s_sc[...] / l_sc[...]


def mile_per_row(logits, targets, class_tile=None):
    """Runs the Pallas kernel; returns per-row (ce_loss, entropy), each shape (N,).

    `logits` may be float32 or bfloat16 — math is f32 in-kernel either way. bf16
    halves HBM read traffic and is strongly preferred on v5e (purely HBM-bound
    there); it also helps on v6e and slightly on v7x.  `class_tile` (static int,
    multiple of 128) forces class-axis tiling.  Targets outside [0, C) other than
    -100 silently produce ce = logsumexp (no gather match), unlike torch.
    """
    n, c = logits.shape
    itemsize = jnp.dtype(logits.dtype).itemsize
    tile_budget, vmem_limit = _vmem_sizing()

    if class_tile is not None and class_tile % 128 == 0 and class_tile < c:
        tc = class_tile
    elif c > _SINGLE_BLOCK_MAX_C:
        tc = _find_class_tile(c)
    else:
        tc = None

    tm = _choose_tm(n, tc if tc is not None else c, itemsize, tile_budget)
    grid_rows = pl.cdiv(n, tm)

    t = targets.astype(jnp.int32).reshape(n, 1)
    out_shape = (jax.ShapeDtypeStruct((n, 1), jnp.float32),
                 jax.ShapeDtypeStruct((n, 1), jnp.float32))

    if tc is None:
        ce, pt = pl.pallas_call(
            _mile_single_c_kernel,
            out_shape=out_shape,
            grid=(grid_rows,),
            in_specs=[pl.BlockSpec((tm, c), lambda i: (i, 0)),
                      pl.BlockSpec((tm, 1), lambda i: (i, 0))],
            out_specs=(pl.BlockSpec((tm, 1), lambda i: (i, 0)),
                       pl.BlockSpec((tm, 1), lambda i: (i, 0))),
            compiler_params=pltpu.CompilerParams(
                dimension_semantics=("parallel",),
                vmem_limit_bytes=vmem_limit),
        )(logits, t)
    else:
        grid_cls = pl.cdiv(c, tc)
        ce, pt = pl.pallas_call(
            functools.partial(_mile_tiled_c_kernel, class_tile=tc, num_classes=c),
            out_shape=out_shape,
            grid=(grid_rows, grid_cls),
            in_specs=[pl.BlockSpec((tm, tc), lambda i, j: (i, j)),
                      pl.BlockSpec((tm, 1), lambda i, j: (i, 0))],
            out_specs=(pl.BlockSpec((tm, 1), lambda i, j: (i, 0)),
                       pl.BlockSpec((tm, 1), lambda i, j: (i, 0))),
            scratch_shapes=[pltpu.VMEM((tm, 1), jnp.float32)] * 4,
            compiler_params=pltpu.CompilerParams(
                dimension_semantics=("parallel", "arbitrary"),
                vmem_limit_bytes=vmem_limit),
        )(logits, t)

    return ce[:, 0], pt[:, 0]


@functools.partial(jax.jit,
                   static_argnames=("gamma", "sigma", "reduction", "class_tile"))
def mile_loss(logits, targets, gamma=1.0, sigma=1.0, reduction="mean", class_tile=None):
    ce, pt = mile_per_row(logits, targets, class_tile=class_tile)
    w = (sigma + pt) ** gamma
    # NOTE: mean(w) includes ignore_index rows (their ce is 0) — matches the torch module.
    alpha = 1.0 / jnp.mean(w)
    loss = alpha * w * ce
    if reduction == "mean":
        return jnp.mean(loss)
    if reduction == "sum":
        return jnp.sum(loss)
    return loss


def _reference(logits, targets, gamma=1.0, sigma=1.0):
    # pure-JAX reference mirroring the PyTorch module
    logits = logits.astype(jnp.float32)
    logp = jax.nn.log_softmax(logits, axis=-1)
    valid = targets != _IGNORE_INDEX
    safe_t = jnp.where(valid, targets, 0)
    ce = -jnp.take_along_axis(logp, safe_t[:, None], axis=-1)[:, 0]
    ce = jnp.where(valid, ce, 0.0)
    probs = jnp.clip(jax.nn.softmax(logits, axis=-1), _EPS, 1.0)
    pt = jnp.sum(-probs * jnp.log(probs), axis=-1)
    w = (sigma + pt) ** gamma
    alpha = 1.0 / jnp.mean(w)
    return jnp.mean(alpha * w * ce)


if __name__ == "__main__":
    key = jax.random.PRNGKey(0)
    k1, k2, k3, k4 = jax.random.split(key, 4)

    # --- single-class-block path (batch=2, seq=8 -> N=16 rows, C=128 classes) ---
    N, C = 16, 128
    logits = jax.random.normal(k1, (N, C), dtype=jnp.float32)
    targets = jax.random.randint(k2, (N,), 0, C, dtype=jnp.int32)
    targets = targets.at[3].set(_IGNORE_INDEX)            # exercise ignore_index

    out = jax.block_until_ready(mile_loss(logits, targets))
    ref = _reference(logits, targets)
    assert jnp.allclose(out, ref, rtol=1e-5, atol=1e-5), (out, ref)

    # --- class-tiled (online-softmax) path, forced with class_tile=128 ---
    # N=24 with TM=16 also exercises the no-pad partial tail row block.
    N2, C2 = 24, 256
    logits2 = jax.random.normal(k3, (N2, C2), dtype=jnp.float32)
    targets2 = jax.random.randint(k4, (N2,), 0, C2, dtype=jnp.int32)
    targets2 = targets2.at[5].set(_IGNORE_INDEX)

    out2 = jax.block_until_ready(mile_loss(logits2, targets2, class_tile=128))
    ref2 = _reference(logits2, targets2)
    assert jnp.allclose(out2, ref2, rtol=1e-4, atol=1e-5), (out2, ref2)

    # --- bf16 logits feed (halves HBM reads; kernel math stays f32) ---
    logits_bf16 = logits.astype(jnp.bfloat16)
    out3 = jax.block_until_ready(mile_loss(logits_bf16, targets))
    ref3 = _reference(logits_bf16.astype(jnp.float32), targets)
    assert jnp.allclose(out3, ref3, rtol=1e-4, atol=1e-4), (out3, ref3)

    print("KERNEL_OK")
</pallas_src>

<mosaic_0001>
module attributes {stable_mosaic.version = 11 : i64} {
  func.func @_mile_single_c_kernel(%arg0: i32, %arg1: memref<8x128xf32, #tpu.memory_space<vmem>>, %arg2: memref<8x1xi32, #tpu.memory_space<vmem>>, %arg3: memref<8x1xf32, #tpu.memory_space<vmem>>, %arg4: memref<8x1xf32, #tpu.memory_space<vmem>>) attributes {dimension_semantics = [#tpu.dimension_semantics<parallel>], iteration_bounds = array<i64: 2>, scalar_prefetch = 0 : i64, scratch_operands = 0 : i64, tpu.core_type = #tpu.core_type<tc>, window_params = [{transform_indices = @transform_0, window_bounds = array<i64: 8, 128>}, {transform_indices = @transform_1, window_bounds = array<i64: 8, 1>}, {transform_indices = @transform_2, window_bounds = array<i64: 8, 1>}, {transform_indices = @transform_3, window_bounds = array<i64: 8, 1>}]} {
    %c0 = arith.constant 0 : index
    %c0_0 = arith.constant 0 : index
    %0 = vector.load %arg1[%c0, %c0_0] : memref<8x128xf32, #tpu.memory_space<vmem>>, vector<8x128xf32>
    %c0_1 = arith.constant 0 : index
    %c0_2 = arith.constant 0 : index
    %1 = vector.load %arg2[%c0_1, %c0_2] : memref<8x1xi32, #tpu.memory_space<vmem>>, vector<8x1xi32>
    %cst = arith.constant dense<0xFF800000> : vector<8xf32>
    %2 = vector.multi_reduction <maximumf>, %0, %cst [1] : vector<8x128xf32> to vector<8xf32>
    %3 = vector.shape_cast %2 : vector<8xf32> to vector<8x1xf32>
    %4 = vector.broadcast %3 : vector<8x1xf32> to vector<8x128xf32>
    %5 = arith.subf %0, %4 : vector<8x128xf32>
    %6 = tpu.iota {dimensions = array<i32: 1>} : vector<8x128xi32>
    %7 = vector.broadcast %1 : vector<8x1xi32> to vector<8x128xi32>
    %8 = arith.cmpi eq, %6, %7 : vector<8x128xi32>
    %cst_3 = arith.constant 0.000000e+00 : f32
    %9 = vector.broadcast %cst_3 : f32 to vector<8x128xf32>
    %10 = arith.select %8, %5, %9 : vector<8x128xi1>, vector<8x128xf32>
    %cst_4 = arith.constant dense<0.000000e+00> : vector<8xf32>
    %11 = vector.multi_reduction <add>, %10, %cst_4 [1] : vector<8x128xf32> to vector<8xf32>
    %12 = vector.shape_cast %11 : vector<8xf32> to vector<8x1xf32>
    %13 = math.exp %5 : vector<8x128xf32>
    %cst_5 = arith.constant dense<0.000000e+00> : vector<8xf32>
    %14 = vector.multi_reduction <add>, %13, %cst_5 [1] : vector<8x128xf32> to vector<8xf32>
    %15 = vector.shape_cast %14 : vector<8xf32> to vector<8x1xf32>
    %16 = arith.mulf %13, %5 : vector<8x128xf32>
    %cst_6 = arith.constant dense<0.000000e+00> : vector<8xf32>
    %17 = vector.multi_reduction <add>, %16, %cst_6 [1] : vector<8x128xf32> to vector<8xf32>
    %18 = vector.shape_cast %17 : vector<8xf32> to vector<8x1xf32>
    %19 = math.log %15 : vector<8x1xf32>
    %c-100_i32 = arith.constant -100 : i32
    %20 = vector.broadcast %c-100_i32 : i32 to vector<8x1xi32>
    %21 = arith.cmpi ne, %1, %20 : vector<8x1xi32>
    %22 = arith.subf %19, %12 : vector<8x1xf32>
    %cst_7 = arith.constant 0.000000e+00 : f32
    %23 = vector.broadcast %cst_7 : f32 to vector<8x1xf32>
    %24 = arith.select %21, %22, %23 : vector<8x1xi1>, vector<8x1xf32>
    %c0_8 = arith.constant 0 : index
    %c0_9 = arith.constant 0 : index
    %25 = vector.load %arg3[%c0_8, %c0_9] : memref<8x1xf32, #tpu.memory_space<vmem>>, vector<8x1xf32>
    tpu.vector_store %arg3[%c0_8, %c0_9], %24 {strides = array<i32>} : memref<8x1xf32, #tpu.memory_space<vmem>>, vector<8x1xf32>,
    %26 = arith.divf %18, %15 : vector<8x1xf32>
    %27 = arith.subf %19, %26 : vector<8x1xf32>
    %c0_10 = arith.constant 0 : index
    %c0_11 = arith.constant 0 : index
    %28 = vector.load %arg4[%c0_10, %c0_11] : memref<8x1xf32, #tpu.memory_space<vmem>>, vector<8x1xf32>
    tpu.vector_store %arg4[%c0_10, %c0_11], %27 {strides = array<i32>} : memref<8x1xf32, #tpu.memory_space<vmem>>, vector<8x1xf32>,
    return
  }
  func.func @transform_0(%arg0: i32) -> (i32, i32) {
    %c0_i32 = arith.constant 0 : i32
    %c0_i32_0 = arith.constant 0 : i32
    return %arg0, %c0_i32 : i32, i32
  }
  func.func @transform_1(%arg0: i32) -> (i32, i32) {
    %c0_i32 = arith.constant 0 : i32
    %c0_i32_0 = arith.constant 0 : i32
    return %arg0, %c0_i32 : i32, i32
  }
  func.func @transform_2(%arg0: i32) -> (i32, i32) {
    %c0_i32 = arith.constant 0 : i32
    %c0_i32_0 = arith.constant 0 : i32
    return %arg0, %c0_i32 : i32, i32
  }
  func.func @transform_3(%arg0: i32) -> (i32, i32) {
    %c0_i32 = arith.constant 0 : i32
    %c0_i32_0 = arith.constant 0 : i32
    return %arg0, %c0_i32 : i32, i32
  }
}

</mosaic_0001>

<bundles_post_ra>
// kernel: mile_loss.1
= control target key start
LH: loop header
LB: loop body
LE: loop exit
PB: predicated region body
PF: predicated region fallthrough
CT: control target
= control target key end

     0   :  { %s391_s12 = smov 0   ;;  %s422_s0 = inlined_call_operand.vmem [shape: f32[16,128], index: 0, kind: input, shape index: {}]   ;;  %s423_s1 = inlined_call_operand.vmem [shape: s32[16,1], index: 1, kind: input, shape index: {}]   ;;  %s424_s2 = inlined_call_operand.vmem [shape: f32[16,1], index: 2, kind: output, shape index: {0}]   ;;  %s425_s3 = inlined_call_operand.vmem [shape: f32[16,1], index: 3, kind: output, shape index: {1}]  }
   0x1 LB: > { %s335_s13 = sadd.s32 4294967295, %s368_s12   ;;  %p339_p0 = scmp.ge.s32.totalorder %s368_s12, 1  ;;  %s368_s12 = sphi %s391_s12, %s14_s12  }
   0x2   : > { %p148_p1 = scmp.lt.s32.totalorder %s368_s12, 3 }
   0x4   : > { %p149_p2 = pnand %p339_p0, %p148_p1 }
   0x5   : > { %p178_p3 = scmp.lt.s32.totalorder (!%p149_p2), %s335_s13, 1 }
   0x6   : > { %152 = sbr.rel (%p149_p2) target bundleno = 280 (0x118), region = 28 }
   0xb   : > { %v370_v0 = vmov 0   ;;  %s427_s13 = smov (!%p178_p3, %s335_s13), 1  ;;  %v199_v7 = vlaneseq  ;;  %vm220_vm2 = vcmask 7168  }
   0xc   : > { %355 = vset.pattern.permute.xlu0 %v370_v0  ;;  %s399_s14 = sshll.u32 %s427_s13, 3 }
   0xd   : > { %s181_s17 = scalar_lea.vmem %s422_s0, %s399_s14  ;;  %s185_s20 = scalar_lea.vmem %s423_s1, %s399_s14  ;;  %v200_v8 = vand.u32 127, %v199_v7 }
   0xe   : > { %v194_v1 = vld [vmem:[%s181_s17] sm:$0xff]  ;;  %s189_s23 = scalar_lea.vmem %s424_s2, %s399_s14  ;;  %s193_s26 = scalar_lea.vmem %s425_s3, %s399_s14 }
   0xf   : > { %196 = vmax.xlane.f32.xlu0 %v194_v1  ;;  %v195_v2 = vld [vmem:[%s185_s20] sm:$0xff] }
  0x10   : > { %vm217_vm1 = vcmp.ne.s32.totalorder %v195_v2, 4294967196 }
  0x23   : > { %202 = vperm.xlu0 %355, %v195_v2  }
  0x82   : > { %v197_v3 = vpop.xlane.xlu0 %196 }
  0x83   : > { %v198_v4 = vsub.f32 %v194_v1, %v197_v3 }
  0x85   : > { %v208_v5 = vmul.f32 1.442695, %v198_v4 }
  0x87   : > { %356 = vpow2.f32 %v208_v5 }
  0x8d   : > { %v357_v6 = vpop.eup %356 }
  0x8e   : > { %210 = vadd.xlane.f32.xlu1 %v357_v6  ;;  %v212_v9 = vmul.f32 %v357_v6, %v198_v4 }
  0x95   : > { %v203_v10 = vpop.permute.xlu0 %202 }
  0x96   : > { %vm204_vm0 = vcmp.eq.s32.totalorder %v200_v8, %v203_v10  ;;  %213 = vadd.xlane.f32.xlu1 %v212_v9 }
  0x97   : > { %v205_v11 = vsel %vm204_vm0, %v198_v4, 0.0 }
  0x98   : > { %206 = vadd.xlane.f32.xlu2 %v205_v11 }
 0x101   : > { %v211_v12 = vpop.xlane.xlu1 %210 }
 0x102   : > { %358 = vrcp.f32 %v211_v12  ;;  %v233_v19 = vand.u32 2147483648, %v211_v12  ;;  %v231_v22 = vand.u32 2147483647, %v211_v12  ;;  %vm227_vm4 = vweird.f32 %v211_v12 }
 0x103   : > { %360 = vlog2.f32 %v211_v12 }
 0x104   : > { %v234_v25 = vor.u32 1.1754944e-38, %v233_v19  ;;  %vm232_vm6 = vcmp.eq.f32.partialorder %v231_v22, 8.507059e+37 }
 0x108   : > { %v359_v13 = vpop.eup %358 }
 0x109   : > { %v361_v14 = vpop.eup %360  ;;  %v223_v15 = vmul.f32 %v359_v13, %v211_v12  ;;  %vm228_vm3 = vweird.f32 %v359_v13  ;;  %v214_v28 = vpop.xlane.xlu1 %213 }
 0x10a   : > { %v216_v16 = vmul.f32 0.6931472, %v361_v14  ;;  %vm229_vm5 = vmor %vm227_vm4, %vm228_vm3 }
 0x10b   : > { %v224_v17 = vsub.f32 1.0, %v223_v15  ;;  %v207_v18 = vpop.xlane.xlu2 %206 }
 0x10c   : > { %v218_v20 = vsub.f32 %v216_v16, %v207_v18 }
 0x10d   : > { %v225_v21 = vmul.f32 %v359_v13, %v224_v17 }
 0x10e   : > { %v219_v23 = vsel %vm217_vm1, %v218_v20, 0.0 }
 0x10f   : > { %v226_v24 = vadd.f32 %v359_v13, %v225_v21  ;;  %221 = vst.msk [vmem:[%s189_s23] sm:$0xff] %vm220_vm2, %v219_v23 }
 0x111   : > { %v230_v26 = vsel %vm229_vm5, %v359_v13, %v226_v24 }
 0x112   : > { %v235_v27 = vsel %vm232_vm6, %v234_v25, %v230_v26 }
 0x113   : > { %v236_v29 = vmul.f32 %v235_v27, %v214_v28 }
 0x115   : > { %v237_v30 = vsub.f32 %v216_v16, %v236_v29 }
 0x117   : > { %238 = vst.msk [vmem:[%s193_s26] sm:$0xff] %vm220_vm2, %v237_v30 }
 0x118 PF: > { %s14_s12 = sadd.s32 1, %s368_s12  }
 0x119   : > { %p11_p4 = scmp.ge.s32.totalorder %s14_s12, 4  }
 0x11b   :  { %13 = sbr.rel (!%p11_p4) target bundleno = 1 (0x1), region = 73 }

</bundles_post_ra>
